<compile_context>
chip_gen: v6e
topology: v6e:2x2x1
jax: 0.10.0
libtpu: 0.0.40
codegen_flags: <defaults>
</compile_context>

<pallas_src>
import functools

import jax
import jax.numpy as jnp
from jax.experimental import pallas as pl
from jax.experimental.pallas import tpu as pltpu

HIDDEN = 768  # fixed by IdealGradientCompressionModule.__init__


@functools.lru_cache(maxsize=None)
def _vmem_limit_bytes():
    """Scoped-VMEM request per generation: ~half of physical, capped at 64 MiB.

    v5e/v6e (128 MiB physical) -> 64 MiB; v7x (64 MiB physical per TC) -> 32 MiB.
    Falls back to a conservative 32 MiB if the query is unavailable.
    """
    default = 32 * 1024 * 1024
    try:
        cap = getattr(pltpu.get_tpu_info(), "vmem_capacity_bytes", None)
        if not cap:
            return default
        return int(min(64 * 1024 * 1024, cap // 2))
    except Exception:
        return default


# ---------------------------------------------------------------------------
# select_k on the tiny (B, S) score array — plain JAX (outside the kernels).
# Matches torch select_k(y_soft, k, keep_first_unit=True): column 0 is forced
# to (global min - 1), then rank via stable double argsort, keep rank < k.
# ---------------------------------------------------------------------------
def select_k(y_soft, k, keep_first_unit=True):
    ys = y_soft
    if keep_first_unit:
        ys = ys.at[:, 0].set(jnp.min(y_soft) - 1.0)   # torch: y_soft.min() - 1
    order = jnp.argsort(ys, axis=-1, stable=True)
    rank = jnp.argsort(order, axis=-1, stable=True)
    return rank < k


# ---------------------------------------------------------------------------
# Row-tiling helper: sublane-aligned tile, and keep >= 2 grid steps whenever
# possible so the "parallel" grid axis shards across both TCs on v7x.
# ---------------------------------------------------------------------------
def _choose_tile_m(total_rows, target):
    target = max(8, (target // 8) * 8)
    if total_rows <= 8:
        return 8
    half = (((total_rows + 1) // 2) + 7) // 8 * 8     # ceil(M/2) rounded up to 8
    return max(8, min(target, half))


# ---------------------------------------------------------------------------
# Teacher path kernel: per-row y_soft = -mean(|grad|)   (memory-bound stream)
# Input arrives in its native dtype; cast to f32 per tile (VPU) for the reduce.
# ---------------------------------------------------------------------------
def _teacher_kernel(grad_ref, ysoft_ref):
    g = grad_ref[...].astype(jnp.float32)                         # (TILE_M, H)
    ysoft_ref[...] = -jnp.mean(jnp.abs(g), axis=-1, keepdims=True)


def teacher_forward(grad, compression_rate, *, tile_m=2048):
    B, S, H = grad.shape
    k = max(int(S * (1.0 - compression_rate)), 1)
    M = B * S
    tm = _choose_tile_m(M, tile_m)

    x2 = grad.reshape(M, H)            # native dtype: no extra HBM cast/pad pass
    in_bytes = x2.size * x2.dtype.itemsize

    y = pl.pallas_call(
        _teacher_kernel,
        out_shape=jax.ShapeDtypeStruct((M, 1), jnp.float32),
        grid_spec=pltpu.PrefetchScalarGridSpec(
            num_scalar_prefetch=0,
            grid=(pl.cdiv(M, tm),),    # ragged tail handled by Pallas masking
            in_specs=[pl.BlockSpec((tm, H), lambda i: (i, 0))],
            out_specs=pl.BlockSpec((tm, 1), lambda i: (i, 0)),
        ),
        compiler_params=pltpu.CompilerParams(
            dimension_semantics=("parallel",),
            vmem_limit_bytes=_vmem_limit_bytes()),
        cost_estimate=pl.CostEstimate(flops=2 * M * H, transcendentals=0,
                                      bytes_accessed=in_bytes + M * 4),
    )(x2)

    y_soft = y[:, 0].reshape(B, S)
    y_hard = select_k(y_soft, k)
    return y_hard, y_soft


# ---------------------------------------------------------------------------
# Student path kernel: BERTStudentPruner MLP + sigmoid (MXU-bound fused MLP)
#   - x tile arrives already in the MXU dtype (cast once in the wrapper)
#   - w1/w2 are cast once in the wrapper (bf16 default) and stay VMEM-resident
#   - bias add / ReLU / final 768->1 lane-reduce / sigmoid stay in f32 (VPU/EUP)
# ---------------------------------------------------------------------------
def _student_kernel(x_ref, w1_ref, b1_ref, w2_ref, b2_ref, w3_ref, b3_ref,
                    ysoft_ref):
    x = x_ref[...]                                                # (TILE_M, H) mxu dtype
    h1 = jnp.dot(x, w1_ref[...], preferred_element_type=jnp.float32)
    h1 = jnp.maximum(h1 + b1_ref[...], 0.0)                       # bias + ReLU (f32)
    h2 = jnp.dot(h1.astype(x.dtype), w2_ref[...],
                 preferred_element_type=jnp.float32)
    h2 = jnp.maximum(h2 + b2_ref[...], 0.0)                       # bias + ReLU (f32)
    # final Linear(768 -> 1): VPU multiply + lane reduction (N=1 would waste the MXU)
    logit = jnp.sum(h2 * w3_ref[...], axis=-1, keepdims=True) + b3_ref[0, 0]
    ysoft_ref[...] = jax.nn.sigmoid(logit)                        # (TILE_M, 1)


def student_forward(embedding_sequence, compression_rate, params, *,
                    tile_m=1024, mxu_dtype=jnp.bfloat16):
    B, S, H = embedding_sequence.shape
    k = max(int(S * (1.0 - compression_rate)), 1)
    w1, b1, w2, b2, w3, b3 = params

    M = B * S
    tm = _choose_tile_m(M, tile_m)

    x2 = embedding_sequence.reshape(M, H).astype(mxu_dtype)  # cast once: half x HBM/VMEM
    w1c = w1.astype(mxu_dtype)      # cast once; DMA'd once and resident across grid
    w2c = w2.astype(mxu_dtype)

    flops = 2 * 2 * M * H * H + 2 * M * H          # two 768x768 matmuls + 768->1 reduce
    bytes_accessed = (x2.size * x2.dtype.itemsize
                      + w1c.size * w1c.dtype.itemsize + w2c.size * w2c.dtype.itemsize
                      + (b1.size + b2.size + w3.size + b3.size) * 4
                      + M * 4)

    y = pl.pallas_call(
        _student_kernel,
        out_shape=jax.ShapeDtypeStruct((M, 1), jnp.float32),
        grid_spec=pltpu.PrefetchScalarGridSpec(
            num_scalar_prefetch=0,
            grid=(pl.cdiv(M, tm),),                            # no wrapper-side pad
            in_specs=[
                pl.BlockSpec((tm, H), lambda i: (i, 0)),           # x row tile (mxu dtype)
                pl.BlockSpec((H, H), lambda i: (0, 0)),            # w1 (resident)
                pl.BlockSpec((1, H), lambda i: (0, 0)),            # b1 (resident, f32)
                pl.BlockSpec((H, H), lambda i: (0, 0)),            # w2 (resident)
                pl.BlockSpec((1, H), lambda i: (0, 0)),            # b2 (resident, f32)
                pl.BlockSpec((1, H), lambda i: (0, 0)),            # w3 (resident, f32)
                pl.BlockSpec(memory_space=pltpu.MemorySpace.SMEM), # b3 scalar
            ],
            out_specs=pl.BlockSpec((tm, 1), lambda i: (i, 0)),
        ),
        compiler_params=pltpu.CompilerParams(
            dimension_semantics=("parallel",),
            vmem_limit_bytes=_vmem_limit_bytes()),
        cost_estimate=pl.CostEstimate(flops=flops, transcendentals=M,
                                      bytes_accessed=bytes_accessed),
    )(x2, w1c, b1, w2c, b2, w3, b3)

    y_soft = y[:, 0].reshape(B, S)
    y_hard = select_k(y_soft, k)
    return y_hard, y_soft


def init_student_params(key, hidden=HIDDEN):
    """Deterministic init matching torch.nn.Linear shapes (W stored as (in, out))."""
    k1, k2, k3, k4, k5, k6 = jax.random.split(key, 6)
    s = 1.0 / jnp.sqrt(hidden)
    w1 = jax.random.uniform(k1, (hidden, hidden), jnp.float32, -s, s)
    b1 = jax.random.uniform(k2, (1, hidden), jnp.float32, -s, s)
    w2 = jax.random.uniform(k3, (hidden, hidden), jnp.float32, -s, s)
    b2 = jax.random.uniform(k4, (1, hidden), jnp.float32, -s, s)
    w3 = jax.random.uniform(k5, (1, hidden), jnp.float32, -s, s)   # Linear(768 -> 1)
    b3 = jax.random.uniform(k6, (1, 1), jnp.float32, -s, s)
    return (w1, b1, w2, b2, w3, b3)


# ---------------------------------------------------------------------------
# Pure-JAX references for verification
# ---------------------------------------------------------------------------
def _ref_select_k(y_soft, k):
    """torch select_k semantics (min-1 sentinel + double sort)."""
    ys = y_soft.at[:, 0].set(jnp.min(y_soft) - 1.0)
    order = jnp.argsort(ys, axis=-1, stable=True)
    rank = jnp.argsort(order, axis=-1, stable=True)
    return rank < k


def _student_ref(x, params, mxu_dtype):
    w1, b1, w2, b2, w3, b3 = params
    B, S, H = x.shape
    x2 = x.reshape(B * S, H)
    h1 = jnp.maximum(jnp.dot(x2.astype(mxu_dtype), w1.astype(mxu_dtype),
                             preferred_element_type=jnp.float32) + b1, 0.0)
    h2 = jnp.maximum(jnp.dot(h1.astype(mxu_dtype), w2.astype(mxu_dtype),
                             preferred_element_type=jnp.float32) + b2, 0.0)
    logit = jnp.sum(h2 * w3, axis=-1) + b3[0, 0]
    return jax.nn.sigmoid(logit).reshape(B, S)


if __name__ == "__main__":
    B, S, H = 2, 8, HIDDEN
    compression_rate = 0.5
    k = max(int(S * (1.0 - compression_rate)), 1)

    key = jax.random.PRNGKey(0)
    kg, ke, kp = jax.random.split(key, 3)
    grad = jax.random.normal(kg, (B, S, H), jnp.float32)
    embedding_sequence = jax.random.normal(ke, (B, S, H), jnp.float32)
    params = init_student_params(kp)

    # --- teacher path (use_teacher_output=True), f32 grads.
    # At M=16 the tile chooser caps tm to 8 -> a 2-step parallel grid is exercised.
    y_hard, y_soft = teacher_forward(grad, compression_rate)
    jax.block_until_ready((y_hard, y_soft))
    ref_soft = -jnp.mean(jnp.abs(grad), axis=-1)
    ref_hard = _ref_select_k(ref_soft, k)
    assert jnp.allclose(y_soft, ref_soft, atol=1e-5), "teacher y_soft mismatch"
    assert bool(jnp.all(y_hard == ref_hard)), "teacher y_hard mismatch"
    assert int(jnp.sum(y_hard[0])) == k and bool(y_hard[0, 0]), "top-k invariant broken"

    # --- teacher path with bf16 grads: native-dtype streaming (half the HBM bytes) ---
    grad_bf = grad.astype(jnp.bfloat16)
    tb_hard, tb_soft = teacher_forward(grad_bf, compression_rate)
    jax.block_until_ready((tb_hard, tb_soft))
    ref_bf = -jnp.mean(jnp.abs(grad_bf.astype(jnp.float32)), axis=-1)
    assert jnp.allclose(tb_soft, ref_bf, atol=1e-5), "teacher y_soft mismatch (bf16 grads)"

    # --- student path (use_teacher_output=False), f32 MXU path: exact check ---
    sy_hard, sy_soft = student_forward(embedding_sequence, compression_rate, params,
                                       mxu_dtype=jnp.float32)
    jax.block_until_ready((sy_hard, sy_soft))
    ref32 = _student_ref(embedding_sequence, params, jnp.float32)
    assert jnp.allclose(sy_soft, ref32, atol=1e-5), "student y_soft mismatch (f32)"
    assert bool(jnp.all(sy_hard == _ref_select_k(ref32, k))), "student y_hard mismatch (f32)"

    # --- student path, default bf16 MXU operands (perf path on v5e/v6e/v7x) ---
    by_hard, by_soft = student_forward(embedding_sequence, compression_rate, params)
    jax.block_until_ready((by_hard, by_soft))
    refbf = _student_ref(embedding_sequence, params, jnp.bfloat16)
    assert jnp.allclose(by_soft, refbf, atol=2e-3), "student y_soft mismatch (bf16)"
    assert jnp.allclose(by_soft, ref32, atol=5e-2), "student bf16 path drifted from f32"

    print("KERNEL_OK")
</pallas_src>

<mosaic_0001>
module attributes {stable_mosaic.version = 11 : i64} {
  func.func @_teacher_kernel(%arg0: i32, %arg1: memref<8x768xf32, #tpu.memory_space<vmem>>, %arg2: memref<8x1xf32, #tpu.memory_space<vmem>>) attributes {dimension_semantics = [#tpu.dimension_semantics<parallel>], iteration_bounds = array<i64: 2>, scalar_prefetch = 0 : i64, scratch_operands = 0 : i64, tpu.core_type = #tpu.core_type<tc>, window_params = [{transform_indices = @transform_0, window_bounds = array<i64: 8, 768>}, {transform_indices = @transform_1, window_bounds = array<i64: 8, 1>}]} {
    %c0 = arith.constant 0 : index
    %c0_0 = arith.constant 0 : index
    %0 = vector.load %arg1[%c0, %c0_0] : memref<8x768xf32, #tpu.memory_space<vmem>>, vector<8x768xf32>
    %1 = math.absf %0 : vector<8x768xf32>
    %cst = arith.constant dense<0.000000e+00> : vector<8xf32>
    %2 = vector.multi_reduction <add>, %1, %cst [1] : vector<8x768xf32> to vector<8xf32>
    %3 = vector.shape_cast %2 : vector<8xf32> to vector<8x1xf32>
    %cst_1 = arith.constant 7.680000e+02 : f32
    %4 = vector.broadcast %cst_1 : f32 to vector<8x1xf32>
    %5 = arith.divf %3, %4 : vector<8x1xf32>
    %cst_2 = arith.constant 0.000000e+00 : f32
    %6 = vector.broadcast %cst_2 : f32 to vector<8x1xf32>
    %7 = arith.subf %6, %5 : vector<8x1xf32>
    %c0_3 = arith.constant 0 : index
    %c0_4 = arith.constant 0 : index
    %8 = vector.load %arg2[%c0_3, %c0_4] : memref<8x1xf32, #tpu.memory_space<vmem>>, vector<8x1xf32>
    tpu.vector_store %arg2[%c0_3, %c0_4], %7 {strides = array<i32>} : memref<8x1xf32, #tpu.memory_space<vmem>>, vector<8x1xf32>,
    return
  }
  func.func @transform_0(%arg0: i32) -> (i32, i32) {
    %c0_i32 = arith.constant 0 : i32
    %c0_i32_0 = arith.constant 0 : i32
    return %arg0, %c0_i32 : i32, i32
  }
  func.func @transform_1(%arg0: i32) -> (i32, i32) {
    %c0_i32 = arith.constant 0 : i32
    %c0_i32_0 = arith.constant 0 : i32
    return %arg0, %c0_i32 : i32, i32
  }
}

</mosaic_0001>

<bundles_post_ra>
// kernel: tpu_custom_call.1
= control target key start
LH: loop header
LB: loop body
LE: loop exit
PB: predicated region body
PF: predicated region fallthrough
CT: control target
= control target key end

     0   :  { %6 = vsyncpa [#allocation3], 0  ;;  %s439_s0 = inlined_call_operand.hbm [shape: f32[16,768], index: 0, kind: input, shape index: {}]   ;;  %s440_s1 = inlined_call_operand.vmem [shape: f32[16,1], index: 1, kind: output, shape index: {}]  }
   0x1   :  { %8 = vsyncpa [#allocation3 + $0x1], 0  ;;  %s347_s6 = smov 0   ;;  %s349_s7 = smov 0  }
   0x2   :  { %s351_s8 = smov 0   ;;  %s353_s9 = smov 0  }
   0x3 LB: > { %s366_s10 = sadd.s32 4294967295, %s334_s9   ;;  %s369_s11 = sadd.s32 1, %s334_s9   ;;  %s334_s9 = sphi %s353_s9, %s449_s9   ;;  %s330_s8 = sphi %s351_s8, %s448_s8   ;;  %s326_s7 = sphi %s349_s7, %s447_s7   ;;  %s322_s6 = sphi %s347_s6, %s446_s6  }
   0x4   : > { %s18_s12 = ssub.s32 %s334_s9, %s369_s11  ;;  %s21_s13 = sadd.s32 1, %s330_s8 }
   0x5   : > { %p19_p0 = scmp.eq.s32.totalorder %s18_s12, 0  ;;  %p28_p1 = scmp.ne.s32.totalorder %s330_s8, %s326_s7 }
   0x6   : > { %p29_p2 = scmp.eq.s32.totalorder %s334_s9, 0  ;;  %p34_p3 = scmp.ne.s32.totalorder %s326_s7, %s322_s6 }
   0x7   : > { %s379_s14 = scalar_select %p19_p0, %s330_s8, %s21_s13  }
   0x8   : > { %p30_p4 = por %p29_p2, %p28_p1  ;;  %p35_p5 = scmp.eq.s32.totalorder %s366_s10, 0 }
   0x9   : > { %p239_p6 = scmp.lt.s32.totalorder %s334_s9, 2  ;;  %s84_s16 = sand.u32 1, %s330_s8  }
   0xa   : > { %p383_p7 = por %p35_p5, %p34_p3  ;;  %s230_s17 = smul.u32 48, %s84_s16 }
   0xb   : > { %s231_s18 = smul.u32 768, %s334_s9  ;;  %p389_p8 = pnand %p239_p6, %p30_p4 }
   0xc   : > { %s442_s15 = scalar_select %p383_p7, 1, 0 }
   0xd   : > { %s397_s22 = scalar_lea.hbm %s439_s0, %s231_s18  ;;  %s88_s23 = scalar_lea.vmem [#allocation2], %s230_s17 }
   0xe   : > { %s96_s24 = sshll.u32 %s88_s23, 4  ;;  %s85_s25 = scalar_lea.sflag [#allocation3], %s84_s16  ;;  %s97_s24 = int_to_ptr.vmem [resolvable:$true] %s96_s24 }
   0xf   : > { %s272_s26 = scalar_lea.hbm %s397_s22, 768  ;;  %p274_p11 = pneg %p389_p8 }
  0x10   : > { %p273_p10 = scmp.ne.s32.totalorder %s397_s22, %s272_s26  ;;  %s277_s29 = scalar_lea.hbm %s439_s0, 1536 }
  0x11   : > { %p278_p0 = scmp.lt.s32.totalorder %s397_s22, %s439_s0  ;;  %p279_p1 = scmp.lt.s32.totalorder %s277_s29, %s272_s26 }
  0x12   : > { %p275_p12 = pnand %p274_p11, %p273_p10 }
  0x13   : > { %p280_p2 = por %p279_p1, %p278_p0 }
  0x14   : > { %p276_p13 = pneg %p275_p12 }
  0x16   : > { %p281_p3 = pnand %p280_p2, %p276_p13 }
  0x18   : > { %284 = shalt.err (!%p281_p3)
}
  0x19   : > { %s285_s3 = scalar_lea.vmem %s97_s24, 768  ;;  %s336_s4 = smov [#allocation2]  }
  0x1a   : > { %p286_p4 = scmp.ne.s32.totalorder %s97_s24, %s285_s3  ;;  %s290_s5 = sshll.u32 %s336_s4, 4  ;;  %s291_s5 = int_to_ptr.vmem [resolvable:$false] %s290_s5 }
  0x1b   : > { %s292_s6 = scalar_lea.vmem %s291_s5, 1536  ;;  %p293_p10 = scmp.lt.s32.totalorder %s97_s24, %s291_s5 }
  0x1c   : > { %p288_p5 = pnand %p286_p4, %p274_p11  ;;  %p294_p12 = scmp.lt.s32.totalorder %s292_s6, %s285_s3 }
  0x1e   : > { %p289_p6 = pneg %p288_p5  ;;  %p295_p9 = por %p294_p12, %p293_p10 }
  0x20   : > { %p296_p7 = pnand %p295_p9, %p289_p6 }
  0x22   : > { %299 = shalt.err (!%p296_p7)
}
  0x23   : > { %238 = dma.hbm_to_vmem [thread:$0]  (!%p389_p8), %s397_s22, 768, %s97_s24, %s85_s25  }
  0x24   : > { %p101_p13 = scmp.lt.s32.totalorder %s334_s9, 3  ;;  %p444_p0 = scmp.ge.s32.totalorder %s334_s9, 1 }
  0x26   : > { %p102_p1 = pnand %p444_p0, %p101_p13 }
  0x27   : > { %s107_s12 = sand.u32 (!%p102_p1), 1, %s326_s7   ;;  %p445_p11 = scmp.ne.s32.totalorder (!%p102_p1), %s442_s15, 0 }
  0x28   : > { %105 = sbr.rel (%p102_p1) target bundleno = 202 (0xca), region = 24  ;;  %s108_s16 = scalar_lea.sflag (!%p102_p1), [#allocation3], %s107_s12 }
  0x29   : > { %s232_s13 = smul.u32 (!%p102_p1), 48, %s107_s12 }
  0x2b   : > { %s111_s17 = scalar_lea.vmem (!%p102_p1), [#allocation2], %s232_s13 }
  0x2d   : > { %317 = dma.done.wait (%p445_p11), %s108_s16, 768  }
  0x2e   : > { %319 = vsyncadd (%p445_p11), %s108_s16, 4294966528  ;;  %v133_v0 = vld [vmem:[%s111_s17] sm:$0xff]  ;;  %v134_v1 = vld [vmem:[%s111_s17 + $0x8] sm:$0xff]  ;;  %p129_p7 = scmp.lt.s32.totalorder %s366_s10, 1  ;;  %vm155_vm0 = vcmask 7168  }
  0x2f   : > { %v135_v2 = vld [vmem:[%s111_s17 + $0x10] sm:$0xff]  ;;  %v136_v3 = vld [vmem:[%s111_s17 + $0x18] sm:$0xff]  ;;  %v139_v4 = vand.u32 2147483647, %v133_v0  ;;  %v140_v5 = vand.u32 2147483647, %v134_v1 }
  0x30   : > { %v141_v6 = vand.u32 2147483647, %v135_v2  ;;  %v137_v7 = vld [vmem:[%s111_s17 + $0x20] sm:$0xff]  ;;  %v142_v8 = vand.u32 2147483647, %v136_v3  ;;  %v138_v10 = vld [vmem:[%s111_s17 + $0x28] sm:$0xff] }
  0x31   : > { %v145_v9 = vadd.f32 %v140_v5, %v139_v4  ;;  %v143_v11 = vand.u32 2147483647, %v137_v7  ;;  %v144_v13 = vand.u32 2147483647, %v138_v10  ;;  %s451_s10 = smov (!%p129_p7, %s366_s10), 1 }
  0x32   : > { %s227_s9 = sshll.u32 %s451_s10, 3 }
  0x33   : > { %v146_v12 = vadd.f32 %v145_v9, %v141_v6  ;;  %s132_s19 = scalar_lea.vmem %s440_s1, %s227_s9 }
  0x35   : > { %v147_v14 = vadd.f32 %v146_v12, %v142_v8 }
  0x37   : > { %v148_v15 = vadd.f32 %v147_v14, %v143_v11 }
  0x39   : > { %v149_v16 = vadd.f32 %v148_v15, %v144_v13 }
  0x3b   : > { %150 = vadd.xlane.f32.xlu0 %v149_v16 }
  0xc4   : > { %v151_v17 = vpop.xlane.xlu0 %150 }
  0xc5   : > { %v153_v18 = vmul.f32 0.0013020834, %v151_v17 }
  0xc7   : > { %v154_v19 = vsub.f32 0.0, %v153_v18 }
  0xc9   : > { %156 = vst.msk [vmem:[%s132_s19] sm:$0xff] %vm155_vm0, %v154_v19 }
  0xca PF: > { %p11_p8 = scmp.ge.s32.totalorder %s369_s11, 4   ;;  %s446_s6 = smov %s326_s7 }
  0xcb   : > { %s447_s7 = smov %s330_s8  ;;  %s448_s8 = smov %s379_s14 }
  0xcc   : > { %s449_s9 = smov %s369_s11  ;;  %13 = sbr.rel (!%p11_p8) target bundleno = 3 (0x3), region = 64 }
  0xd1   :  { %176 = vsyncpa [#allocation3], 1 }
  0xd2   :  { %178 = vsyncpa [#allocation3 + $0x1], 1 }

</bundles_post_ra>
